<compile_context>
chip_gen: v7x
topology: tpu7x:2x2x1
jax: 0.10.0
libtpu: 0.0.40
codegen_flags: <defaults>
</compile_context>

<pallas_src>
import functools

import jax
import jax.numpy as jnp
from jax import lax
from jax.experimental import pallas as pl
from jax.experimental.pallas import tpu as pltpu

H_PAD = 128   # lane-dense padded hidden width
C_PAD = 128   # lane-dense padded class width


# ---------------------------------------------------------------------------
# Fused kernel: [tile 0] SAGE1 -> ReLU -> SAGE2 -> ReLU -> classifier projection
#               [every tile] SMEM-index edge gather -> bias -> masked log_softmax
# ---------------------------------------------------------------------------
def fused_graph_sage_edge_kernel(
    # scalar-prefetch refs (SMEM)
    src_sm,       # (E_pad,)          int32
    dst_sm,       # (E_pad,)          int32
    # inputs (VMEM, full-array blocks; constant block index across grid -> DMA'd once)
    a_ref,        # (N, N)            bf16  integer in-edge counts (dst, src), exact <= 256
    dinv_ref,     # (N, 1)            f32   1 / max(in_degree, 1)
    x_ref,        # (N, F)            bf16  node features
    w1_ref,       # (F, 2*H_PAD)      bf16  [W1_l | W1_r] zero-padded
    b1_ref,       # (1, H_PAD)        f32
    w2_ref,       # (H_PAD, 2*H_PAD)  bf16  [W2_l | W2_r]
    b2_ref,       # (1, H_PAD)        f32
    wc_ref,       # (H_PAD, 2*C_PAD)  bf16  [Wc_src | Wc_dst]  (single 256-wide matmul)
    bc_ref,       # (1, C_PAD)        f32
    # output
    out_ref,      # (TE, C_PAD)       f32   log-probs for this edge tile
    # scratch (persist across grid steps)
    psrc_scr,     # (N, C_PAD)        f32   h2 @ Wc_src  per node
    pdst_scr,     # (N, C_PAD)        f32   h2 @ Wc_dst  per node
    lgt_scr,      # (TE, C_PAD)       f32   gathered logits for this tile
    *,
    num_classes,
    edges_per_tile,
):
    f32, bf16 = jnp.float32, jnp.bfloat16
    t = pl.program_id(0)
    hp = b1_ref.shape[1]          # H_PAD
    cp = bc_ref.shape[1]          # C_PAD

    # ------------------- node phase: runs once, results live in VMEM scratch ----------------
    @pl.when(t == 0)
    def _():
        a = a_ref[...]            # (N, N) bf16 exact counts
        dinv = dinv_ref[...]      # (N, 1) f32

        def sage_layer(x_b, w_ref, b_ref):
            # merged projection: one MXU matmul with 256-wide output (x @ [W_l | W_r])
            proj = jnp.dot(x_b, w_ref[...], preferred_element_type=f32)          # (N, 2*hp)
            # project-first aggregation A @ (x @ W_l); exact counts, f32 1/deg rescale
            neigh = jnp.dot(a, proj[:, :hp].astype(bf16),
                            preferred_element_type=f32) * dinv
            return jnp.maximum(neigh + proj[:, hp:] + b_ref[...], 0.0)           # pads stay 0

        h1 = sage_layer(x_ref[...], w1_ref, b1_ref)          # (N, H_PAD) f32
        # F.dropout(training=False) -> identity
        h2 = sage_layer(h1.astype(bf16), w2_ref, b2_ref)     # (N, H_PAD) f32

        # fused classifier projection (256-wide output), split into the two gather tables:
        #   logits[e] = psrc[src_e] + pdst[dst_e] + b_c
        p = jnp.dot(h2.astype(bf16), wc_ref[...], preferred_element_type=f32)    # (N, 2*C_PAD)
        psrc_scr[...] = p[:, :cp]
        pdst_scr[...] = p[:, cp:]

    # ------------------- edge phase: SMEM-index gather, bias, masked log_softmax -------------
    base = t * edges_per_tile

    @pl.loop(0, edges_per_tile, unroll=True)
    def _(i):
        s = src_sm[base + i]
        d = dst_sm[base + i]
        lgt_scr[pl.ds(i, 1), :] = psrc_scr[pl.ds(s, 1), :] + pdst_scr[pl.ds(d, 1), :]

    logits = lgt_scr[...] + bc_ref[...]                                           # (TE, C_PAD)
    col_ids = lax.broadcasted_iota(jnp.int32, logits.shape, 1)
    logits = jnp.where(col_ids < num_classes, logits, jnp.float32(-1e30))
    m = jnp.max(logits, axis=-1, keepdims=True)
    z = logits - m
    lse = jnp.log(jnp.sum(jnp.exp(z), axis=-1, keepdims=True))
    out_ref[...] = z - lse


# ---------------------------------------------------------------------------
# Wrapper: adjacency build + weight merge/pad (XLA glue), single pallas_call
# ---------------------------------------------------------------------------
def build_adjacency(edge_index, num_nodes):
    src = edge_index[0]
    dst = edge_index[1]
    cnt = jnp.zeros((num_nodes, num_nodes), jnp.float32).at[dst, src].add(1.0)
    deg = jnp.sum(cnt, axis=-1, keepdims=True)
    dinv = 1.0 / jnp.maximum(deg, 1.0)      # rows with no in-edges -> mean over empty set = 0
    return cnt, dinv


def _pad_to(arr, shape):
    return jnp.pad(arr, [(0, t - s) for s, t in zip(arr.shape, shape)])


@functools.partial(jax.jit, static_argnames=("edge_tile",))
def graph_sage_edge_forward(params, x, edge_index, *, edge_tile=16):
    n, f = x.shape
    e = edge_index.shape[1]
    h = params["w1_l"].shape[1]           # hidden = 16
    c = params["w_c"].shape[1]            # edge_classes

    cnt, dinv = build_adjacency(edge_index, n)
    a_cnt = cnt.astype(jnp.bfloat16)      # exact integer counts (multiplicity <= 256)
    xb = x.astype(jnp.bfloat16)

    # merged + lane-padded projection weights: cols [0:H_PAD) -> W_l, [H_PAD:2*H_PAD) -> W_r
    w1 = jnp.concatenate([_pad_to(params["w1_l"], (f, H_PAD)),
                          _pad_to(params["w1_r"], (f, H_PAD))], axis=1).astype(jnp.bfloat16)
    w2 = jnp.concatenate([_pad_to(params["w2_l"], (H_PAD, H_PAD)),
                          _pad_to(params["w2_r"], (H_PAD, H_PAD))], axis=1).astype(jnp.bfloat16)
    b1 = _pad_to(params["b1_l"], (1, H_PAD))
    b2 = _pad_to(params["b2_l"], (1, H_PAD))
    # fused classifier weight: cols [0:C_PAD) act on h[src], [C_PAD:2*C_PAD) act on h[dst]
    wc = jnp.concatenate([_pad_to(params["w_c"][:h], (H_PAD, C_PAD)),
                          _pad_to(params["w_c"][h:], (H_PAD, C_PAD))], axis=1).astype(jnp.bfloat16)
    bc = _pad_to(params["b_c"], (1, C_PAD))

    num_tiles = -(-e // edge_tile)
    e_pad = num_tiles * edge_tile
    src = jnp.pad(edge_index[0].astype(jnp.int32), (0, e_pad - e))
    dst = jnp.pad(edge_index[1].astype(jnp.int32), (0, e_pad - e))

    node_args = (a_cnt, dinv, xb, w1, b1, w2, b2, wc, bc)

    def full_spec(arr):  # whole array resident; constant block index -> fetched once
        return pl.BlockSpec(arr.shape, lambda t, s_sm, d_sm: (0, 0))

    out_pad = pl.pallas_call(
        functools.partial(fused_graph_sage_edge_kernel,
                          num_classes=c, edges_per_tile=edge_tile),
        out_shape=jax.ShapeDtypeStruct((e_pad, C_PAD), jnp.float32),
        grid_spec=pltpu.PrefetchScalarGridSpec(
            num_scalar_prefetch=2,
            grid=(num_tiles,),
            in_specs=[full_spec(arr) for arr in node_args],
            out_specs=pl.BlockSpec((edge_tile, C_PAD), lambda t, s_sm, d_sm: (t, 0)),
            scratch_shapes=[pltpu.VMEM((n, C_PAD), jnp.float32),
                            pltpu.VMEM((n, C_PAD), jnp.float32),
                            pltpu.VMEM((edge_tile, C_PAD), jnp.float32)],
        ),
        compiler_params=pltpu.CompilerParams(
            # "arbitrary": node-phase scratch is filled at tile 0 and reused by later tiles.
            dimension_semantics=("arbitrary",),
            vmem_limit_bytes=32 * 1024 * 1024,
        ),
    )(src, dst, *node_args)

    return out_pad[:e, :c]


# ---------------------------------------------------------------------------
# Pure-JAX f32 reference (matches the PyTorch module semantics)
# ---------------------------------------------------------------------------
def reference_forward(params, x, edge_index):
    n = x.shape[0]
    cnt, dinv = build_adjacency(edge_index, n)
    a = cnt * dinv

    def sage(a, x, wl, wr, bl):
        return jnp.maximum((a @ x) @ wl + x @ wr + bl, 0.0)

    hh = sage(a, x, params["w1_l"], params["w1_r"], params["b1_l"])
    hh = sage(a, hh, params["w2_l"], params["w2_r"], params["b2_l"])
    ef = jnp.concatenate([hh[edge_index[0]], hh[edge_index[1]]], axis=-1)
    logits = ef @ params["w_c"] + params["b_c"]
    return jax.nn.log_softmax(logits, axis=-1)


def init_params(key, features, hidden, edge_classes):
    ks = jax.random.split(key, 7)
    scale = lambda fan_in: 1.0 / jnp.sqrt(jnp.float32(fan_in))
    return {
        "w1_l": jax.random.normal(ks[0], (features, hidden), jnp.float32) * scale(features),
        "w1_r": jax.random.normal(ks[1], (features, hidden), jnp.float32) * scale(features),
        "b1_l": jax.random.normal(ks[2], (1, hidden), jnp.float32) * 0.01,
        "w2_l": jax.random.normal(ks[3], (hidden, hidden), jnp.float32) * scale(hidden),
        "w2_r": jax.random.normal(ks[4], (hidden, hidden), jnp.float32) * scale(hidden),
        "b2_l": jax.random.normal(ks[5], (1, hidden), jnp.float32) * 0.01,
        "w_c": jax.random.normal(ks[6], (2 * hidden, edge_classes), jnp.float32) * scale(2 * hidden),
        "b_c": jnp.zeros((1, edge_classes), jnp.float32),
    }


if __name__ == "__main__":
    FEATURES = 8
    HIDDEN = 16
    EDGE_CLASSES = 4
    NUM_NODES = 16
    NUM_EDGES = 32

    key = jax.random.PRNGKey(0)
    k_x, k_e, k_p = jax.random.split(key, 3)

    x = jax.random.normal(k_x, (NUM_NODES, FEATURES), jnp.float32)
    edge_index = jax.random.randint(k_e, (2, NUM_EDGES), 0, NUM_NODES, dtype=jnp.int32)
    params = init_params(k_p, FEATURES, HIDDEN, EDGE_CLASSES)

    out = graph_sage_edge_forward(params, x, edge_index)
    out = jax.block_until_ready(out)
    ref = reference_forward(params, x, edge_index)

    assert out.shape == (NUM_EDGES, EDGE_CLASSES)
    assert bool(jnp.all(jnp.isfinite(out)))
    # rows of log_softmax must exp-sum to 1 (softmax done in f32 in-kernel)
    assert jnp.allclose(jnp.exp(out).sum(axis=1), 1.0, atol=1e-5)
    # bf16 matmul operands with f32 accumulation; adjacency counts exact + f32 1/deg rescale
    assert jnp.allclose(out, ref, atol=5e-2), float(jnp.max(jnp.abs(out - ref)))
    print("KERNEL_OK")
</pallas_src>

<mosaic_0001>
module attributes {stable_mosaic.version = 11 : i64} {
  func.func private @main(%arg0: i32) attributes {dimension_semantics = [#tpu.dimension_semantics<core_parallel>], iteration_bounds = array<i64: 2>, tpu.core_type = #tpu.core_type<sc_scalar_subcore>, window_params = []} {
    return
  }
}

module attributes {stable_mosaic.version = 11 : i64} {
  func.func private @main(%arg0: i32) attributes {dimension_semantics = [#tpu.dimension_semantics<core_parallel>], iteration_bounds = array<i64: 2>, tpu.core_type = #tpu.core_type<sc_scalar_subcore>, window_params = []} {
    return
  }
}

module attributes {stable_mosaic.version = 11 : i64} {
  func.func @fused_graph_sage_edge_kernel(%arg0: i32, %arg1: memref<32xi32, #tpu.memory_space<smem>>, %arg2: memref<32xi32, #tpu.memory_space<smem>>, %arg3: memref<16x16xbf16, #tpu.memory_space<vmem>>, %arg4: memref<16x1xf32, #tpu.memory_space<vmem>>, %arg5: memref<16x8xbf16, #tpu.memory_space<vmem>>, %arg6: memref<8x256xbf16, #tpu.memory_space<vmem>>, %arg7: memref<1x128xf32, #tpu.memory_space<vmem>>, %arg8: memref<128x256xbf16, #tpu.memory_space<vmem>>, %arg9: memref<1x128xf32, #tpu.memory_space<vmem>>, %arg10: memref<128x256xbf16, #tpu.memory_space<vmem>>, %arg11: memref<1x128xf32, #tpu.memory_space<vmem>>, %arg12: memref<16x128xf32, #tpu.memory_space<vmem>>, %arg13: memref<16x128xf32, #tpu.memory_space<vmem>>, %arg14: memref<16x128xf32, #tpu.memory_space<vmem>>, %arg15: memref<16x128xf32, #tpu.memory_space<vmem>>) attributes {dimension_semantics = [#tpu.dimension_semantics<arbitrary>], iteration_bounds = array<i64: 2>, scalar_prefetch = 2 : i64, scratch_operands = 3 : i64, tpu.core_type = #tpu.core_type<tc>, window_params = [{pipeline_mode = #tpu.pipeline_mode<synchronous>, transform_indices = @transform_0, window_bounds = array<i64: 16, 16>}, {pipeline_mode = #tpu.pipeline_mode<synchronous>, transform_indices = @transform_1, window_bounds = array<i64: 16, 1>}, {pipeline_mode = #tpu.pipeline_mode<synchronous>, transform_indices = @transform_2, window_bounds = array<i64: 16, 8>}, {pipeline_mode = #tpu.pipeline_mode<synchronous>, transform_indices = @transform_3, window_bounds = array<i64: 8, 256>}, {pipeline_mode = #tpu.pipeline_mode<synchronous>, transform_indices = @transform_4, window_bounds = array<i64: 1, 128>}, {pipeline_mode = #tpu.pipeline_mode<synchronous>, transform_indices = @transform_5, window_bounds = array<i64: 128, 256>}, {pipeline_mode = #tpu.pipeline_mode<synchronous>, transform_indices = @transform_6, window_bounds = array<i64: 1, 128>}, {pipeline_mode = #tpu.pipeline_mode<synchronous>, transform_indices = @transform_7, window_bounds = array<i64: 128, 256>}, {pipeline_mode = #tpu.pipeline_mode<synchronous>, transform_indices = @transform_8, window_bounds = array<i64: 1, 128>}, {transform_indices = @transform_9, window_bounds = array<i64: 16, 128>}]} {
    %c0_i32 = arith.constant 0 : i32
    %0 = arith.cmpi eq, %arg0, %c0_i32 : i32
    %1 = arith.extui %0 : i1 to i32
    %c0_i32_0 = arith.constant 0 : i32
    %2 = arith.cmpi ne, %1, %c0_i32_0 : i32
    scf.if %2 {
      %c0_91 = arith.constant 0 : index
      %c0_92 = arith.constant 0 : index
      %264 = vector.load %arg3[%c0_91, %c0_92] : memref<16x16xbf16, #tpu.memory_space<vmem>>, vector<16x16xbf16>
      %c0_93 = arith.constant 0 : index
      %c0_94 = arith.constant 0 : index
      %265 = vector.load %arg4[%c0_93, %c0_94] : memref<16x1xf32, #tpu.memory_space<vmem>>, vector<16x1xf32>
      %c0_95 = arith.constant 0 : index
      %c0_96 = arith.constant 0 : index
      %266 = vector.load %arg5[%c0_95, %c0_96] : memref<16x8xbf16, #tpu.memory_space<vmem>>, vector<16x8xbf16>
      %c0_97 = arith.constant 0 : index
      %c0_98 = arith.constant 0 : index
      %267 = vector.load %arg6[%c0_97, %c0_98] : memref<8x256xbf16, #tpu.memory_space<vmem>>, vector<8x256xbf16>
      %cst_99 = arith.constant dense<0.000000e+00> : vector<16x256xf32>
      %268 = tpu.matmul %266, %267, %cst_99 {dimension_numbers = #tpu.dot_dimension_numbers<[1], [0], [0], [1], [0, 0, 1, 1], [], []>} : vector<16x8xbf16>, vector<8x256xbf16>, vector<16x256xf32> -> vector<16x256xf32>
      %269 = vector.extract_strided_slice %268 {offsets = [0, 0], sizes = [16, 128], strides = [1, 1]} : vector<16x256xf32> to vector<16x128xf32>
      %270 = arith.truncf %269 : vector<16x128xf32> to vector<16x128xbf16>
      %cst_100 = arith.constant dense<0.000000e+00> : vector<16x128xf32>
      %271 = tpu.matmul %264, %270, %cst_100 {dimension_numbers = #tpu.dot_dimension_numbers<[1], [0], [0], [1], [0, 0, 1, 1], [], []>} : vector<16x16xbf16>, vector<16x128xbf16>, vector<16x128xf32> -> vector<16x128xf32>
      %272 = vector.broadcast %265 : vector<16x1xf32> to vector<16x128xf32>
      %273 = arith.mulf %271, %272 : vector<16x128xf32>
      %274 = vector.extract_strided_slice %268 {offsets = [0, 128], sizes = [16, 128], strides = [1, 1]} : vector<16x256xf32> to vector<16x128xf32>
      %275 = arith.addf %273, %274 : vector<16x128xf32>
      %c0_101 = arith.constant 0 : index
      %c0_102 = arith.constant 0 : index
      %276 = vector.load %arg7[%c0_101, %c0_102] : memref<1x128xf32, #tpu.memory_space<vmem>>, vector<1x128xf32>
      %277 = vector.broadcast %276 : vector<1x128xf32> to vector<16x128xf32>
      %278 = arith.addf %275, %277 : vector<16x128xf32>
      %cst_103 = arith.constant 0.000000e+00 : f32
      %279 = vector.broadcast %cst_103 : f32 to vector<16x128xf32>
      %280 = arith.maximumf %278, %279 : vector<16x128xf32>
      %281 = arith.truncf %280 : vector<16x128xf32> to vector<16x128xbf16>
      %c0_104 = arith.constant 0 : index
      %c0_105 = arith.constant 0 : index
      %282 = vector.load %arg8[%c0_104, %c0_105] : memref<128x256xbf16, #tpu.memory_space<vmem>>, vector<128x256xbf16>
      %cst_106 = arith.constant dense<0.000000e+00> : vector<16x256xf32>
      %283 = tpu.matmul %281, %282, %cst_106 {dimension_numbers = #tpu.dot_dimension_numbers<[1], [0], [0], [1], [0, 0, 1, 1], [], []>} : vector<16x128xbf16>, vector<128x256xbf16>, vector<16x256xf32> -> vector<16x256xf32>
      %284 = vector.extract_strided_slice %283 {offsets = [0, 0], sizes = [16, 128], strides = [1, 1]} : vector<16x256xf32> to vector<16x128xf32>
      %285 = arith.truncf %284 : vector<16x128xf32> to vector<16x128xbf16>
      %cst_107 = arith.constant dense<0.000000e+00> : vector<16x128xf32>
      %286 = tpu.matmul %264, %285, %cst_107 {dimension_numbers = #tpu.dot_dimension_numbers<[1], [0], [0], [1], [0, 0, 1, 1], [], []>} : vector<16x16xbf16>, vector<16x128xbf16>, vector<16x128xf32> -> vector<16x128xf32>
      %287 = vector.broadcast %265 : vector<16x1xf32> to vector<16x128xf32>
      %288 = arith.mulf %286, %287 : vector<16x128xf32>
      %289 = vector.extract_strided_slice %283 {offsets = [0, 128], sizes = [16, 128], strides = [1, 1]} : vector<16x256xf32> to vector<16x128xf32>
      %290 = arith.addf %288, %289 : vector<16x128xf32>
      %c0_108 = arith.constant 0 : index
      %c0_109 = arith.constant 0 : index
      %291 = vector.load %arg9[%c0_108, %c0_109] : memref<1x128xf32, #tpu.memory_space<vmem>>, vector<1x128xf32>
      %292 = vector.broadcast %291 : vector<1x128xf32> to vector<16x128xf32>
      %293 = arith.addf %290, %292 : vector<16x128xf32>
      %cst_110 = arith.constant 0.000000e+00 : f32
      %294 = vector.broadcast %cst_110 : f32 to vector<16x128xf32>
      %295 = arith.maximumf %293, %294 : vector<16x128xf32>
      %296 = arith.truncf %295 : vector<16x128xf32> to vector<16x128xbf16>
      %c0_111 = arith.constant 0 : index
      %c0_112 = arith.constant 0 : index
      %297 = vector.load %arg10[%c0_111, %c0_112] : memref<128x256xbf16, #tpu.memory_space<vmem>>, vector<128x256xbf16>
      %cst_113 = arith.constant dense<0.000000e+00> : vector<16x256xf32>
      %298 = tpu.matmul %296, %297, %cst_113 {dimension_numbers = #tpu.dot_dimension_numbers<[1], [0], [0], [1], [0, 0, 1, 1], [], []>} : vector<16x128xbf16>, vector<128x256xbf16>, vector<16x256xf32> -> vector<16x256xf32>
      %299 = vector.extract_strided_slice %298 {offsets = [0, 0], sizes = [16, 128], strides = [1, 1]} : vector<16x256xf32> to vector<16x128xf32>
      %c0_114 = arith.constant 0 : index
      %c0_115 = arith.constant 0 : index
      %300 = vector.load %arg13[%c0_114, %c0_115] : memref<16x128xf32, #tpu.memory_space<vmem>>, vector<16x128xf32>
      tpu.vector_store %arg13[%c0_114, %c0_115], %299 {strides = array<i32>} : memref<16x128xf32, #tpu.memory_space<vmem>>, vector<16x128xf32>,
      %301 = vector.extract_strided_slice %298 {offsets = [0, 128], sizes = [16, 128], strides = [1, 1]} : vector<16x256xf32> to vector<16x128xf32>
      %c0_116 = arith.constant 0 : index
      %c0_117 = arith.constant 0 : index
      %302 = vector.load %arg14[%c0_116, %c0_117] : memref<16x128xf32, #tpu.memory_space<vmem>>, vector<16x128xf32>
      tpu.vector_store %arg14[%c0_116, %c0_117], %301 {strides = array<i32>} : memref<16x128xf32, #tpu.memory_space<vmem>>, vector<16x128xf32>,
    } else {
    }
    %c16_i32 = arith.constant 16 : i32
    %3 = arith.muli %arg0, %c16_i32 : i32
    %c0_i32_1 = arith.constant 0 : i32
    %c1_i32 = arith.constant 1 : i32
    %4 = arith.muli %c0_i32_1, %c1_i32 : i32
    %c0_i32_2 = arith.constant 0 : i32
    %5 = arith.addi %c0_i32_2, %4 : i32
    %6 = arith.addi %3, %5 : i32
    %7 = arith.index_cast %6 : i32 to index
    %8 = memref.load %arg1[%7] : memref<32xi32, #tpu.memory_space<smem>>
    %9 = arith.addi %3, %5 : i32
    %10 = arith.index_cast %9 : i32 to index
    %11 = memref.load %arg2[%10] : memref<32xi32, #tpu.memory_space<smem>>
    %12 = arith.index_cast %8 : i32 to index
    %c0 = arith.constant 0 : index
    %13 = vector.load %arg13[%12, %c0] : memref<16x128xf32, #tpu.memory_space<vmem>>, vector<1x128xf32>
    %14 = arith.index_cast %11 : i32 to index
    %c0_3 = arith.constant 0 : index
    %15 = vector.load %arg14[%14, %c0_3] : memref<16x128xf32, #tpu.memory_space<vmem>>, vector<1x128xf32>
    %16 = arith.addf %13, %15 : vector<1x128xf32>
    %17 = arith.index_cast %5 : i32 to index
    %c0_4 = arith.constant 0 : index
    %18 = vector.load %arg15[%17, %c0_4] : memref<16x128xf32, #tpu.memory_space<vmem>>, vector<1x128xf32>
    tpu.vector_store %arg15[%17, %c0_4], %16 {strides = array<i32>} : memref<16x128xf32, #tpu.memory_space<vmem>>, vector<1x128xf32>,
    %c1_i32_5 = arith.constant 1 : i32
    %c1_i32_6 = arith.constant 1 : i32
    %19 = arith.muli %c1_i32_5, %c1_i32_6 : i32
    %c0_i32_7 = arith.constant 0 : i32
    %20 = arith.addi %c0_i32_7, %19 : i32
    %21 = arith.addi %3, %20 : i32
    %22 = arith.index_cast %21 : i32 to index
    %23 = memref.load %arg1[%22] : memref<32xi32, #tpu.memory_space<smem>>
    %24 = arith.addi %3, %20 : i32
    %25 = arith.index_cast %24 : i32 to index
    %26 = memref.load %arg2[%25] : memref<32xi32, #tpu.memory_space<smem>>
    %27 = arith.index_cast %23 : i32 to index
    %c0_8 = arith.constant 0 : index
    %28 = vector.load %arg13[%27, %c0_8] : memref<16x128xf32, #tpu.memory_space<vmem>>, vector<1x128xf32>
    %29 = arith.index_cast %26 : i32 to index
    %c0_9 = arith.constant 0 : index
    %30 = vector.load %arg14[%29, %c0_9] : memref<16x128xf32, #tpu.memory_space<vmem>>, vector<1x128xf32>
    %31 = arith.addf %28, %30 : vector<1x128xf32>
    %32 = arith.index_cast %20 : i32 to index
    %c0_10 = arith.constant 0 : index
    %33 = vector.load %arg15[%32, %c0_10] : memref<16x128xf32, #tpu.memory_space<vmem>>, vector<1x128xf32>
    tpu.vector_store %arg15[%32, %c0_10], %31 {strides = array<i32>} : memref<16x128xf32, #tpu.memory_space<vmem>>, vector<1x128xf32>,
    %c2_i32 = arith.constant 2 : i32
    %c1_i32_11 = arith.constant 1 : i32
    %34 = arith.muli %c2_i32, %c1_i32_11 : i32
    %c0_i32_12 = arith.constant 0 : i32
    %35 = arith.addi %c0_i32_12, %34 : i32
    %36 = arith.addi %3, %35 : i32
    %37 = arith.index_cast %36 : i32 to index
    %38 = memref.load %arg1[%37] : memref<32xi32, #tpu.memory_space<smem>>
    %39 = arith.addi %3, %35 : i32
    %40 = arith.index_cast %39 : i32 to index
    %41 = memref.load %arg2[%40] : memref<32xi32, #tpu.memory_space<smem>>
    %42 = arith.index_cast %38 : i32 to index
    %c0_13 = arith.constant 0 : index
    %43 = vector.load %arg13[%42, %c0_13] : memref<16x128xf32, #tpu.memory_space<vmem>>, vector<1x128xf32>
    %44 = arith.index_cast %41 : i32 to index
    %c0_14 = arith.constant 0 : index
    %45 = vector.load %arg14[%44, %c0_14] : memref<16x128xf32, #tpu.memory_space<vmem>>, vector<1x128xf32>
    %46 = arith.addf %43, %45 : vector<1x128xf32>
    %47 = arith.index_cast %35 : i32 to index
    %c0_15 = arith.constant 0 : index
    %48 = vector.load %arg15[%47, %c0_15] : memref<16x128xf32, #tpu.memory_space<vmem>>, vector<1x128xf32>
    tpu.vector_store %arg15[%47, %c0_15], %46 {strides = array<i32>} : memref<16x128xf32, #tpu.memory_space<vmem>>, vector<1x128xf32>,
    %c3_i32 = arith.constant 3 : i32
    %c1_i32_16 = arith.constant 1 : i32
    %49 = arith.muli %c3_i32, %c1_i32_16 : i32
    %c0_i32_17 = arith.constant 0 : i32
    %50 = arith.addi %c0_i32_17, %49 : i32
    %51 = arith.addi %3, %50 : i32
    %52 = arith.index_cast %51 : i32 to index
    %53 = memref.load %arg1[%52] : memref<32xi32, #tpu.memory_space<smem>>
    %54 = arith.addi %3, %50 : i32
    %55 = arith.index_cast %54 : i32 to index
    %56 = memref.load %arg2[%55] : memref<32xi32, #tpu.memory_space<smem>>
    %57 = arith.index_cast %53 : i32 to index
    %c0_18 = arith.constant 0 : index
    %58 = vector.load %arg13[%57, %c0_18] : memref<16x128xf32, #tpu.memory_space<vmem>>, vector<1x128xf32>
    %59 = arith.index_cast %56 : i32 to index
    %c0_19 = arith.constant 0 : index
    %60 = vector.load %arg14[%59, %c0_19] : memref<16x128xf32, #tpu.memory_space<vmem>>, vector<1x128xf32>
    %61 = arith.addf %58, %60 : vector<1x128xf32>
    %62 = arith.index_cast %50 : i32 to index
    %c0_20 = arith.constant 0 : index
    %63 = vector.load %arg15[%62, %c0_20] : memref<16x128xf32, #tpu.memory_space<vmem>>, vector<1x128xf32>
    tpu.vector_store %arg15[%62, %c0_20], %61 {strides = array<i32>} : memref<16x128xf32, #tpu.memory_space<vmem>>, vector<1x128xf32>,
    %c4_i32 = arith.constant 4 : i32
    %c1_i32_21 = arith.constant 1 : i32
    %64 = arith.muli %c4_i32, %c1_i32_21 : i32
    %c0_i32_22 = arith.constant 0 : i32
    %65 = arith.addi %c0_i32_22, %64 : i32
    %66 = arith.addi %3, %65 : i32
    %67 = arith.index_cast %66 : i32 to index
    %68 = memref.load %arg1[%67] : memref<32xi32, #tpu.memory_space<smem>>
    %69 = arith.addi %3, %65 : i32
    %70 = arith.index_cast %69 : i32 to index
    %71 = memref.load %arg2[%70] : memref<32xi32, #tpu.memory_space<smem>>
    %72 = arith.index_cast %68 : i32 to index
    %c0_23 = arith.constant 0 : index
    %73 = vector.load %arg13[%72, %c0_23] : memref<16x128xf32, #tpu.memory_space<vmem>>, vector<1x128xf32>
    %74 = arith.index_cast %71 : i32 to index
    %c0_24 = arith.constant 0 : index
    %75 = vector.load %arg14[%74, %c0_24] : memref<16x128xf32, #tpu.memory_space<vmem>>, vector<1x128xf32>
    %76 = arith.addf %73, %75 : vector<1x128xf32>
    %77 = arith.index_cast %65 : i32 to index
    %c0_25 = arith.constant 0 : index
    %78 = vector.load %arg15[%77, %c0_25] : memref<16x128xf32, #tpu.memory_space<vmem>>, vector<1x128xf32>
    tpu.vector_store %arg15[%77, %c0_25], %76 {strides = array<i32>} : memref<16x128xf32, #tpu.memory_space<vmem>>, vector<1x128xf32>,
    %c5_i32 = arith.constant 5 : i32
    %c1_i32_26 = arith.constant 1 : i32
    %79 = arith.muli %c5_i32, %c1_i32_26 : i32
    %c0_i32_27 = arith.constant 0 : i32
    %80 = arith.addi %c0_i32_27, %79 : i32
    %81 = arith.addi %3, %80 : i32
    %82 = arith.index_cast %81 : i32 to index
    %83 = memref.load %arg1[%82] : memref<32xi32, #tpu.memory_space<smem>>
    %84 = arith.addi %3, %80 : i32
    %85 = arith.index_cast %84 : i32 to index
    %86 = memref.load %arg2[%85] : memref<32xi32, #tpu.memory_space<smem>>
    %87 = arith.index_cast %83 : i32 to index
    %c0_28 = arith.constant 0 : index
    %88 = vector.load %arg13[%87, %c0_28] : memref<16x128xf32, #tpu.memory_space<vmem>>, vector<1x128xf32>
    %89 = arith.index_cast %86 : i32 to index
    %c0_29 = arith.constant 0 : index
    %90 = vector.load %arg14[%89, %c0_29] : memref<16x128xf32, #tpu.memory_space<vmem>>, vector<1x128xf32>
    %91 = arith.addf %88, %90 : vector<1x128xf32>
    %92 = arith.index_cast %80 : i32 to index
    %c0_30 = arith.constant 0 : index
    %93 = vector.load %arg15[%92, %c0_30] : memref<16x128xf32, #tpu.memory_space<vmem>>, vector<1x128xf32>
    tpu.vector_store %arg15[%92, %c0_30], %91 {strides = array<i32>} : memref<16x128xf32, #tpu.memory_space<vmem>>, vector<1x128xf32>,
    %c6_i32 = arith.constant 6 : i32
    %c1_i32_31 = arith.constant 1 : i32
    %94 = arith.muli %c6_i32, %c1_i32_31 : i32
    %c0_i32_32 = arith.constant 0 : i32
    %95 = arith.addi %c0_i32_32, %94 : i32
    %96 = arith.addi %3, %95 : i32
    %97 = arith.index_cast %96 : i32 to index
    %98 = memref.load %arg1[%97] : memref<32xi32, #tpu.memory_space<smem>>
    %99 = arith.addi %3, %95 : i32
    %100 = arith.index_cast %99 : i32 to index
    %101 = memref.load %arg2[%100] : memref<32xi32, #tpu.memory_space<smem>>
    %102 = arith.index_cast %98 : i32 to index
    %c0_33 = arith.constant 0 : index
    %103 = vector.load %arg13[%102, %c0_33] : memref<16x128xf32, #tpu.memory_space<vmem>>, vector<1x128xf32>
    %104 = arith.index_cast %101 : i32 to index
    %c0_34 = arith.constant 0 : index
    %105 = vector.load %arg14[%104, %c0_34] : memref<16x128xf32, #tpu.memory_space<vmem>>, vector<1x128xf32>
    %106 = arith.addf %103, %105 : vector<1x128xf32>
    %107 = arith.index_cast %95 : i32 to index
    %c0_35 = arith.constant 0 : index
    %108 = vector.load %arg15[%107, %c0_35] : memref<16x128xf32, #tpu.memory_space<vmem>>, vector<1x128xf32>
    tpu.vector_store %arg15[%107, %c0_35], %106 {strides = array<i32>} : memref<16x128xf32, #tpu.memory_space<vmem>>, vector<1x128xf32>,
    %c7_i32 = arith.constant 7 : i32
    %c1_i32_36 = arith.constant 1 : i32
    %109 = arith.muli %c7_i32, %c1_i32_36 : i32
    %c0_i32_37 = arith.constant 0 : i32
    %110 = arith.addi %c0_i32_37, %109 : i32
    %111 = arith.addi %3, %110 : i32
    %112 = arith.index_cast %111 : i32 to index
    %113 = memref.load %arg1[%112] : memref<32xi32, #tpu.memory_space<smem>>
    %114 = arith.addi %3, %110 : i32
    %115 = arith.index_cast %114 : i32 to index
    %116 = memref.load %arg2[%115] : memref<32xi32, #tpu.memory_space<smem>>
    %117 = arith.index_cast %113 : i32 to index
    %c0_38 = arith.constant 0 : index
    %118 = vector.load %arg13[%117, %c0_38] : memref<16x128xf32, #tpu.memory_space<vmem>>, vector<1x128xf32>
    %119 = arith.index_cast %116 : i32 to index
    %c0_39 = arith.constant 0 : index
    %120 = vector.load %arg14[%119, %c0_39] : memref<16x128xf32, #tpu.memory_space<vmem>>, vector<1x128xf32>
    %121 = arith.addf %118, %120 : vector<1x128xf32>
    %122 = arith.index_cast %110 : i32 to index
    %c0_40 = arith.constant 0 : index
    %123 = vector.load %arg15[%122, %c0_40] : memref<16x128xf32, #tpu.memory_space<vmem>>, vector<1x128xf32>
    tpu.vector_store %arg15[%122, %c0_40], %121 {strides = array<i32>} : memref<16x128xf32, #tpu.memory_space<vmem>>, vector<1x128xf32>,
    %c8_i32 = arith.constant 8 : i32
    %c1_i32_41 = arith.constant 1 : i32
    %124 = arith.muli %c8_i32, %c1_i32_41 : i32
    %c0_i32_42 = arith.constant 0 : i32
    %125 = arith.addi %c0_i32_42, %124 : i32
    %126 = arith.addi %3, %125 : i32
    %127 = arith.index_cast %126 : i32 to index
    %128 = memref.load %arg1[%127] : memref<32xi32, #tpu.memory_space<smem>>
    %129 = arith.addi %3, %125 : i32
    %130 = arith.index_cast %129 : i32 to index
    %131 = memref.load %arg2[%130] : memref<32xi32, #tpu.memory_space<smem>>
    %132 = arith.index_cast %128 : i32 to index
    %c0_43 = arith.constant 0 : index
    %133 = vector.load %arg13[%132, %c0_43] : memref<16x128xf32, #tpu.memory_space<vmem>>, vector<1x128xf32>
    %134 = arith.index_cast %131 : i32 to index
    %c0_44 = arith.constant 0 : index
    %135 = vector.load %arg14[%134, %c0_44] : memref<16x128xf32, #tpu.memory_space<vmem>>, vector<1x128xf32>
    %136 = arith.addf %133, %135 : vector<1x128xf32>
    %137 = arith.index_cast %125 : i32 to index
    %c0_45 = arith.constant 0 : index
    %138 = vector.load %arg15[%137, %c0_45] : memref<16x128xf32, #tpu.memory_space<vmem>>, vector<1x128xf32>
    tpu.vector_store %arg15[%137, %c0_45], %136 {strides = array<i32>} : memref<16x128xf32, #tpu.memory_space<vmem>>, vector<1x128xf32>,
    %c9_i32 = arith.constant 9 : i32
    %c1_i32_46 = arith.constant 1 : i32
    %139 = arith.muli %c9_i32, %c1_i32_46 : i32
    %c0_i32_47 = arith.constant 0 : i32
    %140 = arith.addi %c0_i32_47, %139 : i32
    %141 = arith.addi %3, %140 : i32
    %142 = arith.index_cast %141 : i32 to index
    %143 = memref.load %arg1[%142] : memref<32xi32, #tpu.memory_space<smem>>
    %144 = arith.addi %3, %140 : i32
    %145 = arith.index_cast %144 : i32 to index
    %146 = memref.load %arg2[%145] : memref<32xi32, #tpu.memory_space<smem>>
    %147 = arith.index_cast %143 : i32 to index
    %c0_48 = arith.constant 0 : index
    %148 = vector.load %arg13[%147, %c0_48] : memref<16x128xf32, #tpu.memory_space<vmem>>, vector<1x128xf32>
    %149 = arith.index_cast %146 : i32 to index
    %c0_49 = arith.constant 0 : index
    %150 = vector.load %arg14[%149, %c0_49] : memref<16x128xf32, #tpu.memory_space<vmem>>, vector<1x128xf32>
    %151 = arith.addf %148, %150 : vector<1x128xf32>
    %152 = arith.index_cast %140 : i32 to index
    %c0_50 = arith.constant 0 : index
    %153 = vector.load %arg15[%152, %c0_50] : memref<16x128xf32, #tpu.memory_space<vmem>>, vector<1x128xf32>
    tpu.vector_store %arg15[%152, %c0_50], %151 {strides = array<i32>} : memref<16x128xf32, #tpu.memory_space<vmem>>, vector<1x128xf32>,
    %c10_i32 = arith.constant 10 : i32
    %c1_i32_51 = arith.constant 1 : i32
    %154 = arith.muli %c10_i32, %c1_i32_51 : i32
    %c0_i32_52 = arith.constant 0 : i32
    %155 = arith.addi %c0_i32_52, %154 : i32
    %156 = arith.addi %3, %155 : i32
    %157 = arith.index_cast %156 : i32 to index
    %158 = memref.load %arg1[%157] : memref<32xi32, #tpu.memory_space<smem>>
    %159 = arith.addi %3, %155 : i32
    %160 = arith.index_cast %159 : i32 to index
    %161 = memref.load %arg2[%160] : memref<32xi32, #tpu.memory_space<smem>>
    %162 = arith.index_cast %158 : i32 to index
    %c0_53 = arith.constant 0 : index
    %163 = vector.load %arg13[%162, %c0_53] : memref<16x128xf32, #tpu.memory_space<vmem>>, vector<1x128xf32>
    %164 = arith.index_cast %161 : i32 to index
    %c0_54 = arith.constant 0 : index
    %165 = vector.load %arg14[%164, %c0_54] : memref<16x128xf32, #tpu.memory_space<vmem>>, vector<1x128xf32>
    %166 = arith.addf %163, %165 : vector<1x128xf32>
    %167 = arith.index_cast %155 : i32 to index
    %c0_55 = arith.constant 0 : index
    %168 = vector.load %arg15[%167, %c0_55] : memref<16x128xf32, #tpu.memory_space<vmem>>, vector<1x128xf32>
    tpu.vector_store %arg15[%167, %c0_55], %166 {strides = array<i32>} : memref<16x128xf32, #tpu.memory_space<vmem>>, vector<1x128xf32>,
    %c11_i32 = arith.constant 11 : i32
    %c1_i32_56 = arith.constant 1 : i32
    %169 = arith.muli %c11_i32, %c1_i32_56 : i32
    %c0_i32_57 = arith.constant 0 : i32
    %170 = arith.addi %c0_i32_57, %169 : i32
    %171 = arith.addi %3, %170 : i32
    %172 = arith.index_cast %171 : i32 to index
    %173 = memref.load %arg1[%172] : memref<32xi32, #tpu.memory_space<smem>>
    %174 = arith.addi %3, %170 : i32
    %175 = arith.index_cast %174 : i32 to index
    %176 = memref.load %arg2[%175] : memref<32xi32, #tpu.memory_space<smem>>
    %177 = arith.index_cast %173 : i32 to index
    %c0_58 = arith.constant 0 : index
    %178 = vector.load %arg13[%177, %c0_58] : memref<16x128xf32, #tpu.memory_space<vmem>>, vector<1x128xf32>
    %179 = arith.index_cast %176 : i32 to index
    %c0_59 = arith.constant 0 : index
    %180 = vector.load %arg14[%179, %c0_59] : memref<16x128xf32, #tpu.memory_space<vmem>>, vector<1x128xf32>
    %181 = arith.addf %178, %180 : vector<1x128xf32>
    %182 = arith.index_cast %170 : i32 to index
    %c0_60 = arith.constant 0 : index
    %183 = vector.load %arg15[%182, %c0_60] : memref<16x128xf32, #tpu.memory_space<vmem>>, vector<1x128xf32>
    tpu.vector_store %arg15[%182, %c0_60], %181 {strides = array<i32>} : memref<16x128xf32, #tpu.memory_space<vmem>>, vector<1x128xf32>,
    %c12_i32 = arith.constant 12 : i32
    %c1_i32_61 = arith.constant 1 : i32
    %184 = arith.muli %c12_i32, %c1_i32_61 : i32
    %c0_i32_62 = arith.constant 0 : i32
    %185 = arith.addi %c0_i32_62, %184 : i32
    %186 = arith.addi %3, %185 : i32
    %187 = arith.index_cast %186 : i32 to index
    %188 = memref.load %arg1[%187] : memref<32xi32, #tpu.memory_space<smem>>
    %189 = arith.addi %3, %185 : i32
    %190 = arith.index_cast %189 : i32 to index
    %191 = memref.load %arg2[%190] : memref<32xi32, #tpu.memory_space<smem>>
    %192 = arith.index_cast %188 : i32 to index
    %c0_63 = arith.constant 0 : index
    %193 = vector.load %arg13[%192, %c0_63] : memref<16x128xf32, #tpu.memory_space<vmem>>, vector<1x128xf32>
    %194 = arith.index_cast %191 : i32 to index
    %c0_64 = arith.constant 0 : index
    %195 = vector.load %arg14[%194, %c0_64] : memref<16x128xf32, #tpu.memory_space<vmem>>, vector<1x128xf32>
    %196 = arith.addf %193, %195 : vector<1x128xf32>
    %197 = arith.index_cast %185 : i32 to index
    %c0_65 = arith.constant 0 : index
    %198 = vector.load %arg15[%197, %c0_65] : memref<16x128xf32, #tpu.memory_space<vmem>>, vector<1x128xf32>
    tpu.vector_store %arg15[%197, %c0_65], %196 {strides = array<i32>} : memref<16x128xf32, #tpu.memory_space<vmem>>, vector<1x128xf32>,
    %c13_i32 = arith.constant 13 : i32
    %c1_i32_66 = arith.constant 1 : i32
    %199 = arith.muli %c13_i32, %c1_i32_66 : i32
    %c0_i32_67 = arith.constant 0 : i32
    %200 = arith.addi %c0_i32_67, %199 : i32
    %201 = arith.addi %3, %200 : i32
    %202 = arith.index_cast %201 : i32 to index
    %203 = memref.load %arg1[%202] : memref<32xi32, #tpu.memory_space<smem>>
    %204 = arith.addi %3, %200 : i32
    %205 = arith.index_cast %204 : i32 to index
    %206 = memref.load %arg2[%205] : memref<32xi32, #tpu.memory_space<smem>>
    %207 = arith.index_cast %203 : i32 to index
    %c0_68 = arith.constant 0 : index
    %208 = vector.load %arg13[%207, %c0_68] : memref<16x128xf32, #tpu.memory_space<vmem>>, vector<1x128xf32>
    %209 = arith.index_cast %206 : i32 to index
    %c0_69 = arith.constant 0 : index
    %210 = vector.load %arg14[%209, %c0_69] : memref<16x128xf32, #tpu.memory_space<vmem>>, vector<1x128xf32>
    %211 = arith.addf %208, %210 : vector<1x128xf32>
    %212 = arith.index_cast %200 : i32 to index
    %c0_70 = arith.constant 0 : index
    %213 = vector.load %arg15[%212, %c0_70] : memref<16x128xf32, #tpu.memory_space<vmem>>, vector<1x128xf32>
    tpu.vector_store %arg15[%212, %c0_70], %211 {strides = array<i32>} : memref<16x128xf32, #tpu.memory_space<vmem>>, vector<1x128xf32>,
    %c14_i32 = arith.constant 14 : i32
    %c1_i32_71 = arith.constant 1 : i32
    %214 = arith.muli %c14_i32, %c1_i32_71 : i32
    %c0_i32_72 = arith.constant 0 : i32
    %215 = arith.addi %c0_i32_72, %214 : i32
    %216 = arith.addi %3, %215 : i32
    %217 = arith.index_cast %216 : i32 to index
    %218 = memref.load %arg1[%217] : memref<32xi32, #tpu.memory_space<smem>>
    %219 = arith.addi %3, %215 : i32
    %220 = arith.index_cast %219 : i32 to index
    %221 = memref.load %arg2[%220] : memref<32xi32, #tpu.memory_space<smem>>
    %222 = arith.index_cast %218 : i32 to index
    %c0_73 = arith.constant 0 : index
    %223 = vector.load %arg13[%222, %c0_73] : memref<16x128xf32, #tpu.memory_space<vmem>>, vector<1x128xf32>
    %224 = arith.index_cast %221 : i32 to index
    %c0_74 = arith.constant 0 : index
    %225 = vector.load %arg14[%224, %c0_74] : memref<16x128xf32, #tpu.memory_space<vmem>>, vector<1x128xf32>
    %226 = arith.addf %223, %225 : vector<1x128xf32>
    %227 = arith.index_cast %215 : i32 to index
    %c0_75 = arith.constant 0 : index
    %228 = vector.load %arg15[%227, %c0_75] : memref<16x128xf32, #tpu.memory_space<vmem>>, vector<1x128xf32>
    tpu.vector_store %arg15[%227, %c0_75], %226 {strides = array<i32>} : memref<16x128xf32, #tpu.memory_space<vmem>>, vector<1x128xf32>,
    %c15_i32 = arith.constant 15 : i32
    %c1_i32_76 = arith.constant 1 : i32
    %229 = arith.muli %c15_i32, %c1_i32_76 : i32
    %c0_i32_77 = arith.constant 0 : i32
    %230 = arith.addi %c0_i32_77, %229 : i32
    %231 = arith.addi %3, %230 : i32
    %232 = arith.index_cast %231 : i32 to index
    %233 = memref.load %arg1[%232] : memref<32xi32, #tpu.memory_space<smem>>
    %234 = arith.addi %3, %230 : i32
    %235 = arith.index_cast %234 : i32 to index
    %236 = memref.load %arg2[%235] : memref<32xi32, #tpu.memory_space<smem>>
    %237 = arith.index_cast %233 : i32 to index
    %c0_78 = arith.constant 0 : index
    %238 = vector.load %arg13[%237, %c0_78] : memref<16x128xf32, #tpu.memory_space<vmem>>, vector<1x128xf32>
    %239 = arith.index_cast %236 : i32 to index
    %c0_79 = arith.constant 0 : index
    %240 = vector.load %arg14[%239, %c0_79] : memref<16x128xf32, #tpu.memory_space<vmem>>, vector<1x128xf32>
    %241 = arith.addf %238, %240 : vector<1x128xf32>
    %242 = arith.index_cast %230 : i32 to index
    %c0_80 = arith.constant 0 : index
    %243 = vector.load %arg15[%242, %c0_80] : memref<16x128xf32, #tpu.memory_space<vmem>>, vector<1x128xf32>
    tpu.vector_store %arg15[%242, %c0_80], %241 {strides = array<i32>} : memref<16x128xf32, #tpu.memory_space<vmem>>, vector<1x128xf32>,
    %c16_i32_81 = arith.constant 16 : i32
    %c0_82 = arith.constant 0 : index
    %c0_83 = arith.constant 0 : index
    %244 = vector.load %arg15[%c0_82, %c0_83] : memref<16x128xf32, #tpu.memory_space<vmem>>, vector<16x128xf32>
    %c0_84 = arith.constant 0 : index
    %c0_85 = arith.constant 0 : index
    %245 = vector.load %arg11[%c0_84, %c0_85] : memref<1x128xf32, #tpu.memory_space<vmem>>, vector<1x128xf32>
    %246 = vector.broadcast %245 : vector<1x128xf32> to vector<16x128xf32>
    %247 = arith.addf %244, %246 : vector<16x128xf32>
    %248 = tpu.iota {dimensions = array<i32: 1>} : vector<16x128xi32>
    %c4_i32_86 = arith.constant 4 : i32
    %249 = vector.broadcast %c4_i32_86 : i32 to vector<16x128xi32>
    %250 = arith.cmpi slt, %248, %249 : vector<16x128xi32>
    %cst = arith.constant -1.000000e+30 : f32
    %251 = vector.broadcast %cst : f32 to vector<16x128xf32>
    %252 = arith.select %250, %247, %251 : vector<16x128xi1>, vector<16x128xf32>
    %cst_87 = arith.constant dense<0xFF800000> : vector<16xf32>
    %253 = vector.multi_reduction <maximumf>, %252, %cst_87 [1] : vector<16x128xf32> to vector<16xf32>
    %254 = vector.shape_cast %253 : vector<16xf32> to vector<16x1xf32>
    %255 = vector.broadcast %254 : vector<16x1xf32> to vector<16x128xf32>
    %256 = arith.subf %252, %255 : vector<16x128xf32>
    %257 = math.exp %256 : vector<16x128xf32>
    %cst_88 = arith.constant dense<0.000000e+00> : vector<16xf32>
    %258 = vector.multi_reduction <add>, %257, %cst_88 [1] : vector<16x128xf32> to vector<16xf32>
    %259 = vector.shape_cast %258 : vector<16xf32> to vector<16x1xf32>
    %260 = math.log %259 : vector<16x1xf32>
    %261 = vector.broadcast %260 : vector<16x1xf32> to vector<16x128xf32>
    %262 = arith.subf %256, %261 : vector<16x128xf32>
    %c0_89 = arith.constant 0 : index
    %c0_90 = arith.constant 0 : index
    %263 = vector.load %arg12[%c0_89, %c0_90] : memref<16x128xf32, #tpu.memory_space<vmem>>, vector<16x128xf32>
    tpu.vector_store %arg12[%c0_89, %c0_90], %262 {strides = array<i32>} : memref<16x128xf32, #tpu.memory_space<vmem>>, vector<16x128xf32>,
    return
  }
  func.func @transform_0(%arg0: i32, %arg1: memref<32xi32, #tpu.memory_space<smem>>, %arg2: memref<32xi32, #tpu.memory_space<smem>>) -> (i32, i32) {
    %c0_i32 = arith.constant 0 : i32
    %c0_i32_0 = arith.constant 0 : i32
    %c0_i32_1 = arith.constant 0 : i32
    return %c0_i32, %c0_i32_0 : i32, i32
  }
  func.func @transform_1(%arg0: i32, %arg1: memref<32xi32, #tpu.memory_space<smem>>, %arg2: memref<32xi32, #tpu.memory_space<smem>>) -> (i32, i32) {
    %c0_i32 = arith.constant 0 : i32
    %c0_i32_0 = arith.constant 0 : i32
    %c0_i32_1 = arith.constant 0 : i32
    return %c0_i32, %c0_i32_0 : i32, i32
  }
  func.func @transform_2(%arg0: i32, %arg1: memref<32xi32, #tpu.memory_space<smem>>, %arg2: memref<32xi32, #tpu.memory_space<smem>>) -> (i32, i32) {
    %c0_i32 = arith.constant 0 : i32
    %c0_i32_0 = arith.constant 0 : i32
    %c0_i32_1 = arith.constant 0 : i32
    return %c0_i32, %c0_i32_0 : i32, i32
  }
  func.func @transform_3(%arg0: i32, %arg1: memref<32xi32, #tpu.memory_space<smem>>, %arg2: memref<32xi32, #tpu.memory_space<smem>>) -> (i32, i32) {
    %c0_i32 = arith.constant 0 : i32
    %c0_i32_0 = arith.constant 0 : i32
    %c0_i32_1 = arith.constant 0 : i32
    return %c0_i32, %c0_i32_0 : i32, i32
  }
  func.func @transform_4(%arg0: i32, %arg1: memref<32xi32, #tpu.memory_space<smem>>, %arg2: memref<32xi32, #tpu.memory_space<smem>>) -> (i32, i32) {
    %c0_i32 = arith.constant 0 : i32
    %c0_i32_0 = arith.constant 0 : i32
    %c0_i32_1 = arith.constant 0 : i32
    return %c0_i32, %c0_i32_0 : i32, i32
  }
  func.func @transform_5(%arg0: i32, %arg1: memref<32xi32, #tpu.memory_space<smem>>, %arg2: memref<32xi32, #tpu.memory_space<smem>>) -> (i32, i32) {
    %c0_i32 = arith.constant 0 : i32
    %c0_i32_0 = arith.constant 0 : i32
    %c0_i32_1 = arith.constant 0 : i32
    return %c0_i32, %c0_i32_0 : i32, i32
  }
  func.func @transform_6(%arg0: i32, %arg1: memref<32xi32, #tpu.memory_space<smem>>, %arg2: memref<32xi32, #tpu.memory_space<smem>>) -> (i32, i32) {
    %c0_i32 = arith.constant 0 : i32
    %c0_i32_0 = arith.constant 0 : i32
    %c0_i32_1 = arith.constant 0 : i32
    return %c0_i32, %c0_i32_0 : i32, i32
  }
  func.func @transform_7(%arg0: i32, %arg1: memref<32xi32, #tpu.memory_space<smem>>, %arg2: memref<32xi32, #tpu.memory_space<smem>>) -> (i32, i32) {
    %c0_i32 = arith.constant 0 : i32
    %c0_i32_0 = arith.constant 0 : i32
    %c0_i32_1 = arith.constant 0 : i32
    return %c0_i32, %c0_i32_0 : i32, i32
  }
  func.func @transform_8(%arg0: i32, %arg1: memref<32xi32, #tpu.memory_space<smem>>, %arg2: memref<32xi32, #tpu.memory_space<smem>>) -> (i32, i32) {
    %c0_i32 = arith.constant 0 : i32
    %c0_i32_0 = arith.constant 0 : i32
    %c0_i32_1 = arith.constant 0 : i32
    return %c0_i32, %c0_i32_0 : i32, i32
  }
  func.func @transform_9(%arg0: i32, %arg1: memref<32xi32, #tpu.memory_space<smem>>, %arg2: memref<32xi32, #tpu.memory_space<smem>>) -> (i32, i32) {
    %c0_i32 = arith.constant 0 : i32
    %c0_i32_0 = arith.constant 0 : i32
    return %arg0, %c0_i32 : i32, i32
  }
}

</mosaic_0001>

<bundles_post_ra>
// kernel: graph_sage_edge_forward.1
= control target key start
LH: loop header
LB: loop body
LE: loop exit
PB: predicated region body
PF: predicated region fallthrough
CT: control target
= control target key end

     0   :  { %s1502_s0 = inlined_call_operand.vmem [shape: s32[32], index: 0, kind: input, shape index: {}]   ;;  %s1503_s2 = inlined_call_operand.vmem [shape: bf16[16,16], index: 2, kind: input, shape index: {}]   ;;  %s1504_s3 = inlined_call_operand.vmem [shape: f32[16,1], index: 3, kind: input, shape index: {}]   ;;  %s1505_s4 = inlined_call_operand.vmem [shape: bf16[16,8], index: 4, kind: input, shape index: {}]   ;;  %s1506_s5 = inlined_call_operand.vmem [shape: bf16[8,256], index: 5, kind: input, shape index: {}]   ;;  %s1507_s6 = inlined_call_operand.vmem [shape: f32[1,128], index: 6, kind: input, shape index: {}]   ;;  %s1508_s7 = inlined_call_operand.vmem [shape: bf16[128,256], index: 7, kind: input, shape index: {}]   ;;  %s1509_s8 = inlined_call_operand.vmem [shape: f32[1,128], index: 8, kind: input, shape index: {}]   ;;  %s1510_s9 = inlined_call_operand.vmem [shape: bf16[128,256], index: 9, kind: input, shape index: {}]   ;;  %s1511_s10 = inlined_call_operand.vmem [shape: f32[1,128], index: 10, kind: input, shape index: {}]   ;;  %s1512_s11 = inlined_call_operand.vmem [shape: f32[32,128], index: 11, kind: output, shape index: {}]   ;;  %s1513_s1 = inlined_call_operand.vmem [shape: s32[32], index: 1, kind: input, shape index: {}]  }
   0x1   :  { %1514 = sst [smem:[#allocation9_spill]] %s1503_s2  ;;  %s16_s19 = sshll.u32 %s1502_s0, 4  ;;  %s17_s19 = int_to_ptr.vmem [resolvable:$true] %s16_s19 }
   0x2   :  { %s20_s22 = sshll.u32 %s1513_s1, 4  ;;  %s1220_s23 = scalar_lea.vmem %s17_s19, 16  ;;  %s21_s22 = int_to_ptr.vmem [resolvable:$true] %s20_s22 }
   0x3   :  { %p1221_p0 = scmp.ne.s32.totalorder %s17_s19, %s1220_s23  ;;  %p1225_p1 = scmp.lt.s32.totalorder %s17_s19, %s17_s19 }
   0x4   :  { %p1226_p2 = scmp.lt.s32.totalorder %s1220_s23, %s1220_s23 }
   0x6   :  { %p1227_p3 = por %p1226_p2, %p1225_p1 }
   0x8   :  { %p1228_p4 = pnand %p1227_p3, %p1221_p0 }
   0xa   :  { %1231 = shalt.err (!%p1228_p4)  }
   0xb   :  { %s1254_s24 = smov [#allocation6]   ;;  %s1232_s25 = scalar_lea.vmem %s21_s22, 16 }
   0xc   :  { %19 = dma.vmem_to_smem %s17_s19, 16, %s1254_s24, [#allocation5] }
   0xd   :  { %p1233_p5 = scmp.ne.s32.totalorder %s21_s22, %s1232_s25  ;;  %p1237_p6 = scmp.lt.s32.totalorder %s21_s22, %s21_s22 }
   0xe   :  { %p1238_p7 = scmp.lt.s32.totalorder %s1232_s25, %s1232_s25 }
  0x10   :  { %p1239_p8 = por %p1238_p7, %p1237_p6 }
  0x12   :  { %p1240_p9 = pnand %p1239_p8, %p1233_p5 }
  0x14   :  { %1243 = shalt.err (!%p1240_p9)  }
  0x15   :  { %s1255_s0 = smov [#allocation7]  }
  0x16   :  { %23 = dma.vmem_to_smem %s21_s22, 16, %s1255_s0, [#allocation5] }
  0x17   :  { %1248 = dma.done.wait [#allocation5], 32 }
  0x18   :  { %1249 = vsyncadd [#allocation5], 4294967264 }
  0x19   :  { %25 = sfence }
  0x1a   :  { %s1325_s1 = smov 0  }
  0x1b LB: > { %s1331_s26 = sadd.s32 4294967295, %s1252_s1   ;;  %p1080_p10 = scmp.ge.s32.totalorder %s1252_s1, 1  ;;  %s1252_s1 = sphi %s1325_s1, %s31_s1  }
  0x1c   : > { %p289_p11 = scmp.lt.s32.totalorder %s1252_s1, 3 }
  0x1e   : > { %p290_p12 = pnand %p1080_p10, %p289_p11 }
  0x1f   : > { %s1081_s27 = sshll.u32 (!%p290_p12), %s1331_s26, 1  ;;  %p1083_p0 = scmp.ne.s32.totalorder (!%p290_p12), %s1331_s26, 0 }
  0x20   : > { %293 = sbr.rel (%p290_p12) target bundleno = 1523 (0x5f3), region = 56  ;;  %p321_p13 = scmp.lt.s32.totalorder (!%p290_p12), %s1081_s27, 3 }
  0x27   : > { %s1517_s27 = smov (!%p321_p13, %s1081_s27), 3  ;;  %330 = sbr.rel (%p1083_p0) target bundleno = 1149 (0x47d), region = 60 }
  0x28   : > { %s1082_s28 = sshll.u32 %s1517_s27, 3  ;;  %v337_v0 = vld [vmem:[%s1506_s5] sm:$0xff] (!%p1083_p0)  ;;  %vm352_vm0 = vcmask (!%p1083_p0), 1043456   ;;  %v1256_v3 = vmov (!%p1083_p0), 0   ;;  %vm348_vm1 = vcmask (!%p1083_p0), 64512   ;;  %v1257_v6 = vmov (!%p1083_p0), 0.0  }
  0x29   : > { %s1339_s12 = scalar_lea.vmem %s1512_s11, %s1082_s28  ;;  %v1086_v1 = vcombine.high (!%p1083_p0), %v337_v0, %v337_v0  ;;  %v1085_v2 = vcombine.low (!%p1083_p0), %v337_v0, %v337_v0  ;;  %391 = vmatprep.mubr.bf16.mxu0 (!%p1083_p0), %v1256_v3  ;;  %v1162_v4 = vld [vmem:[%s1505_s4] sm:$0xff] (!%p1083_p0)   ;;  %1159 = vset.pattern.permute.xlu0 (!%p1083_p0), %v1256_v3  ;;  %vm1258_vm2 = vmmov (!%p1083_p0), 0   ;;  %v1169_v10 = vld [vmem:[%s1508_s7 + $0x14] ss:$8 sps:$4 sm:$0xff] (!%p1083_p0)   ;;  %v334_v11 = vld [vmem:[%s1504_s3 + $0x8] sm:$0xff] (!%p1083_p0)  ;;  %s1515_s2 = sld [smem:[#allocation9_spill]] (!%p1083_p0) }
  0x2a   : > { %1134 = vmatprep.subr.bf16.mxu1 (!%p1083_p0), %v1257_v6  ;;  %1136 = vmatprep.mubr.msk.bf16.mxu1 (!%p1083_p0), %vm1258_vm2, %v1257_v6  ;;  %v333_v7 = vld [vmem:[%s1504_s3] sm:$0xff] (!%p1083_p0)  ;;  %v1167_v12 = vld [vmem:[%s1508_s7 + $0x10] ss:$8 sps:$4 sm:$0xff] (!%p1083_p0)   ;;  %v1175_v15 = vld [vmem:[%s1508_s7 + $0x34] ss:$8 sps:$4 sm:$0xff] (!%p1083_p0)   ;;  %vm408_vm3 = vcmask (!%p1083_p0), 130048  }
  0x2b   : > { %1087 = vmatprep.subr.msk.bf16.mxu0 (!%p1083_p0), %vm352_vm0, %v1086_v1  ;;  %v354_v5 = vsel (!%p1083_p0), %vm352_vm0, %v1085_v2, 0  ;;  %v1164_v8 = vld [vmem:[%s1508_s7] ss:$8 sps:$4 sm:$0xff] (!%p1083_p0)   ;;  %455 = vperm.xlu0 (!%p1083_p0), %1159, %v333_v7   ;;  %v1166_v9 = vld [vmem:[%s1508_s7 + $0x4] ss:$8 sps:$4 sm:$0xff] (!%p1083_p0)  }
  0x2c   : > { %360 = vmatpush1.bf16.msra.mxu0 (!%p1083_p0), %v354_v5  ;;  %v1172_v13 = vld [vmem:[%s1508_s7 + $0x24] ss:$8 sps:$4 sm:$0xff] (!%p1083_p0)   ;;  %v1170_v14 = vld [vmem:[%s1508_s7 + $0x20] ss:$8 sps:$4 sm:$0xff] (!%p1083_p0)   ;;  %v1173_v16 = vld [vmem:[%s1508_s7 + $0x30] ss:$8 sps:$4 sm:$0xff] (!%p1083_p0)  }
  0x2d   : > { %575 = vmatprep.subr.bf16.mxu0 (!%p1083_p0), %v1166_v9  ;;  %v1178_v17 = vld [vmem:[%s1508_s7 + $0x44] ss:$8 sps:$4 sm:$0xff] (!%p1083_p0)   ;;  %v1176_v18 = vld [vmem:[%s1508_s7 + $0x40] ss:$8 sps:$4 sm:$0xff] (!%p1083_p0)   ;;  %v1181_v25 = vld [vmem:[%s1508_s7 + $0x54] ss:$8 sps:$4 sm:$0xff] (!%p1083_p0)  }
  0x2e   : > { %v1179_v26 = vld [vmem:[%s1508_s7 + $0x50] ss:$8 sps:$4 sm:$0xff]   ;;  %v1184_v27 = vld [vmem:[%s1508_s7 + $0x64] ss:$8 sps:$4 sm:$0xff]   ;;  %v1182_v28 = vld [vmem:[%s1508_s7 + $0x60] ss:$8 sps:$4 sm:$0xff]  }
  0x2f   : > { %1088 = vmatmul.mubr.msk.bf16.vlgmr.msra.gmra.mrb[0].mxu0 %vm348_vm1, %v1162_v4  ;;  %460 = vperm.xlu0 %1159, %v334_v11   ;;  %v1163_v24 = vld [vmem:[%s1515_s2] sm:$0xff]   ;;  %v1187_v29 = vld [vmem:[%s1508_s7 + $0x74] ss:$8 sps:$4 sm:$0xff]   ;;  %v1185_v30 = vld [vmem:[%s1508_s7 + $0x70] ss:$8 sps:$4 sm:$0xff]  }
  0x30   : > { %607 = vmatprep.mubr.bf16.mxu0 %v1256_v3  ;;  %576 = vmatpush1.bf16.msra.mxu0 %v1164_v8  ;;  %v1091_v36 = vld [vmem:[%s1507_s6] ss:$0 sm:$0xff]  ;;  %v1190_v50 = vld [vmem:[%s1510_s9 + $0x4] ss:$8 sps:$4 sm:$0xff]   ;;  %v1193_v54 = vld [vmem:[%s1510_s9 + $0x14] ss:$8 sps:$4 sm:$0xff]  }
  0x31   : > { %577 = vmatprep.subr.bf16.mxu0 %v1169_v10  ;;  %v1188_v53 = vld [vmem:[%s1510_s9] ss:$8 sps:$4 sm:$0xff]   ;;  %v1191_v55 = vld [vmem:[%s1510_s9 + $0x10] ss:$8 sps:$4 sm:$0xff]   ;;  %v1196_v56 = vld [vmem:[%s1510_s9 + $0x24] ss:$8 sps:$4 sm:$0xff]  }
  0x32   : > { %v1194_v57 = vld [vmem:[%s1510_s9 + $0x20] ss:$8 sps:$4 sm:$0xff]   ;;  %v1199_v58 = vld [vmem:[%s1510_s9 + $0x34] ss:$8 sps:$4 sm:$0xff]   ;;  %v1197_v59 = vld [vmem:[%s1510_s9 + $0x30] ss:$8 sps:$4 sm:$0xff]  }
  0x33   : > { %v1202_v60 = vld [vmem:[%s1510_s9 + $0x44] ss:$8 sps:$4 sm:$0xff]   ;;  %v1200_v61 = vld [vmem:[%s1510_s9 + $0x40] ss:$8 sps:$4 sm:$0xff]   ;;  %v1205_v62 = vld [vmem:[%s1510_s9 + $0x54] ss:$8 sps:$4 sm:$0xff]  }
  0x34   : > { %578 = vmatpush1.bf16.msra.mxu0 %v1167_v12  ;;  %v1203_v63 = vld [vmem:[%s1510_s9 + $0x50] ss:$8 sps:$4 sm:$0xff]   ;;  %v1208_v0 = vld [vmem:[%s1510_s9 + $0x64] ss:$8 sps:$4 sm:$0xff]   ;;  %v1206_v1 = vld [vmem:[%s1510_s9 + $0x60] ss:$8 sps:$4 sm:$0xff]  }
  0x35   : > { %579 = vmatprep.subr.bf16.mxu0 %v1172_v13  ;;  %v1211_v2 = vld [vmem:[%s1510_s9 + $0x74] ss:$8 sps:$4 sm:$0xff]   ;;  %v1109_v7 = vld [vmem:[%s1509_s8] ss:$0 sm:$0xff] }
  0x38   : > { %580 = vmatpush1.bf16.msra.mxu0 %v1170_v14 }
  0x39   : > { %581 = vmatprep.subr.bf16.mxu0 %v1175_v15 }
  0x3c   : > { %582 = vmatpush1.bf16.msra.mxu0 %v1173_v16 }
  0x3d   : > { %583 = vmatprep.subr.bf16.mxu0 %v1178_v17 }
  0x40   : > { %584 = vmatpush1.bf16.msra.mxu0 %v1176_v18 }
  0x41   : > { %585 = vmatprep.subr.bf16.mxu0 %v1181_v25 }
  0x44   : > { %586 = vmatpush1.bf16.msra.mxu0 %v1179_v26 }
  0x45   : > { %587 = vmatprep.subr.bf16.mxu0 %v1184_v27 }
  0x48   : > { %588 = vmatpush1.bf16.msra.mxu0 %v1182_v28 }
  0x49   : > { %589 = vmatprep.subr.bf16.mxu0 %v1187_v29 }
  0x4c   : > { %590 = vmatpush1.bf16.msra.mxu0 %v1185_v30 }
  0xaa   : > { %v456_v31 = vpop.permute.xlu0 %455 }
  0xae   : > { %v461_v35 = vpop.permute.xlu0 %460 }
 0x102   : > { %v393_v19 = vpop.f32.mrb[0].mxu0 }
 0x103   : > { %v395_v20 = vpop.f32.mrb[1].mxu0 }
 0x104   : > { %v397_v21 = vpop.f32.mrb[2].mxu0 }
 0x105   : > { %v402_v22 = vpack.c.bf16 %v397_v21, %v393_v19  ;;  %v399_v23 = vpop.f32.mrb[3].mxu0 }
 0x107   : > { %1135 = vmatpush3.bf16.msra.mxu1 %v402_v22 }
 0x108   : > { %1140 = vmatprep.subr.bf16.mxu1 %v1257_v6 }
 0x10a   : > { %1137 = vmatmul.mubr.msk.bf16.vlgmr.msra.gmra.mrb[0].mxu1 %vm408_vm3, %v1163_v24 }
 0x10b   : > { %1142 = vmatprep.mubr.msk.bf16.mxu1 %vm1258_vm2, %v1257_v6 }
 0x1dd   : > { %v446_v32 = vpop.f32.mrb[0].mxu1 }
 0x1de   : > { %v463_v33 = vmul.f32 %v456_v31, %v446_v32  ;;  %v1138_v34 = vpop.f32.mrb[1].mxu1 }
 0x1df   : > { %v449_v37 = vpop.f32.mrb[2].mxu1 }
 0x1e0   : > { %v465_v38 = vadd.f32 %v463_v33, %v395_v20  ;;  %v464_v39 = vmul.f32 %v461_v35, %v449_v37  ;;  %v1139_v40 = vpop.f32.mrb[3].mxu1 }
 0x1e2   : > { %v474_v41 = vadd.f32 %v1091_v36, %v465_v38  ;;  %v466_v42 = vadd.f32 %v464_v39, %v399_v23 }
 0x1e4   : > { %v475_v43 = vadd.f32 %v1091_v36, %v466_v42  ;;  %v476_v44 = vmax.f32 %v474_v41, 0.0 }
 0x1e6   : > { %v477_v45 = vmax.f32 %v475_v43, 0.0 }
 0x1e8   : > { %v478_v46 = vpack.c.bf16 %v477_v45, %v476_v44 }
 0x1ea   : > { %608 = vmatmul.mubr.bf16.vlgmr.msra.gmra.mrb[4].mxu0 %v478_v46 }
 0x2bd   : > { %v609_v47 = vpop.f32.mrb[4].mxu0 }
 0x2be   : > { %v611_v48 = vpop.f32.mrb[5].mxu0 }
 0x2bf   : > { %v613_v49 = vpop.f32.mrb[6].mxu0 }
 0x2c0   : > { %v618_v51 = vpack.c.bf16 %v613_v49, %v609_v47  ;;  %v615_v52 = vpop.f32.mrb[7].mxu0 }
 0x2c2   : > { %1141 = vmatpush3.bf16.msra.mxu1 %v618_v51 }
 0x2c3   : > { %772 = vmatprep.subr.bf16.mxu1 %v1190_v50 }
 0x2c5   : > { %1143 = vmatmul.mubr.msk.bf16.vlgmr.msra.gmra.mrb[4].mxu1 %vm408_vm3, %v1163_v24 }
 0x2c6   : > { %773 = vmatpush1.bf16.msra.mxu1 %v1188_v53  ;;  %804 = vmatprep.mubr.bf16.mxu1 %v1256_v3  ;;  %v1209_v3 = vld [vmem:[%s1510_s9 + $0x70] ss:$8 sps:$4 sm:$0xff]  }
 0x2c7   : > { %774 = vmatprep.subr.bf16.mxu1 %v1193_v54 }
 0x2ca   : > { %775 = vmatpush1.bf16.msra.mxu1 %v1191_v55 }
 0x2cb   : > { %776 = vmatprep.subr.bf16.mxu1 %v1196_v56 }
 0x2ce   : > { %777 = vmatpush1.bf16.msra.mxu1 %v1194_v57 }
 0x2cf   : > { %778 = vmatprep.subr.bf16.mxu1 %v1199_v58 }
 0x2d2   : > { %779 = vmatpush1.bf16.msra.mxu1 %v1197_v59 }
 0x2d3   : > { %780 = vmatprep.subr.bf16.mxu1 %v1202_v60 }
 0x2d6   : > { %781 = vmatpush1.bf16.msra.mxu1 %v1200_v61 }
 0x2d7   : > { %782 = vmatprep.subr.bf16.mxu1 %v1205_v62 }
 0x2da   : > { %783 = vmatpush1.bf16.msra.mxu1 %v1203_v63 }
 0x2db   : > { %784 = vmatprep.subr.bf16.mxu1 %v1208_v0 }
 0x2de   : > { %785 = vmatpush1.bf16.msra.mxu1 %v1206_v1 }
 0x2df   : > { %786 = vmatprep.subr.bf16.mxu1 %v1211_v2 }
 0x2e2   : > { %787 = vmatpush1.bf16.msra.mxu1 %v1209_v3 }
 0x398   : > { %v653_v4 = vpop.f32.mrb[4].mxu1 }
 0x399   : > { %v660_v5 = vmul.f32 %v653_v4, %v456_v31  ;;  %v1144_v6 = vpop.f32.mrb[5].mxu1 }
 0x39a   : > { %v656_v8 = vpop.f32.mrb[6].mxu1 }
 0x39b   : > { %v662_v9 = vadd.f32 %v660_v5, %v611_v48  ;;  %v661_v10 = vmul.f32 %v656_v8, %v461_v35  ;;  %v1145_v11 = vpop.f32.mrb[7].mxu1 }
 0x39d   : > { %v671_v12 = vadd.f32 %v1109_v7, %v662_v9  ;;  %v663_v13 = vadd.f32 %v661_v10, %v615_v52 }
 0x39f   : > { %v672_v14 = vadd.f32 %v1109_v7, %v663_v13  ;;  %v673_v15 = vmax.f32 %v671_v12, 0.0 }
 0x3a1   : > { %v674_v16 = vmax.f32 %v672_v14, 0.0 }
 0x3a3   : > { %v675_v17 = vpack.c.bf16 %v674_v16, %v673_v15 }
 0x3a5   : > { %805 = vmatmul.mubr.bf16.vlgmr.msra.gmra.mrb[8].mxu1 %v675_v17 }
 0x478   : > { %v806_v18 = vpop.f32.mrb[8].mxu1 }
 0x479   : > { %815 = vst [vmem:[#allocation2] sm:$0xff] %v806_v18  ;;  %v808_v19 = vpop.f32.mrb[9].mxu1 }
 0x47a   : > { %817 = vst [vmem:[#allocation3] sm:$0xff] %v808_v19  ;;  %v810_v20 = vpop.f32.mrb[10].mxu1 }
 0x47b   : > { %816 = vst [vmem:[#allocation2 + $0x8] sm:$0xff] %v810_v20  ;;  %v812_v21 = vpop.f32.mrb[11].mxu1 }
 0x47c   : > { %818 = vst [vmem:[#allocation3 + $0x8] sm:$0xff] %v812_v21 }
 0x47d PF: > { %s1468_s19 = sshll.u32 %s1331_s26, 4  ;;  %v974_v45 = vlaneseq  ;;  %v1127_v54 = vld [vmem:[%s1511_s10] ss:$0 sm:$0xff] }
 0x47e   : > { %s820_s20 = sld [smem:[#allocation6 + %s1468_s19]]  ;;  %s828_s22 = sadd.s32 1, %s1468_s19 }
 0x47f   : > { %s821_s21 = sld [smem:[#allocation7 + %s1468_s19]]  ;;  %s837_s23 = sadd.s32 2, %s1468_s19  ;;  %v1484_v50 = vand.u32 127, %v974_v45 }
 0x480   : > { %s829_s24 = sld [smem:[#allocation6 + %s828_s22]]  ;;  %s846_s28 = sadd.s32 3, %s1468_s19 }
 0x481   : > { %s830_s25 = sld [smem:[#allocation7 + %s828_s22]]  ;;  %s855_s29 = sadd.s32 4, %s1468_s19  ;;  %vm976_vm4 = vcmp.lt.s32.totalorder %v1484_v50, 4 }
 0x482   : > { %s838_s0 = sld [smem:[#allocation6 + %s837_s23]] }
 0x483   : > { %s839_s27 = sld [smem:[#allocation7 + %s837_s23]] }
 0x484   : > { %s847_s30 = sld [smem:[#allocation6 + %s846_s28]]  ;;  %s822_s26 = scalar_lea.vmem [#allocation2], %s820_s20 }
 0x485   : > { %s848_s13 = sld [smem:[#allocation7 + %s846_s28]]  ;;  %v823_v22 = vld [vmem:[%s822_s26] sm:$0x1]  ;;  %s824_s14 = scalar_lea.vmem [#allocation3], %s821_s21 }
 0x486   : > { %v825_v23 = vld [vmem:[%s824_s14] sm:$0x1]  ;;  %s856_s15 = sld [smem:[#allocation6 + %s855_s29]]  ;;  %s831_s17 = scalar_lea.vmem [#allocation2], %s829_s24 }
 0x487   : > { %s857_s16 = sld [smem:[#allocation7 + %s855_s29]]  ;;  %v826_v24 = vadd.f32 %v825_v23, %v823_v22  ;;  %v832_v25 = vld [vmem:[%s831_s17] sm:$0x1]  ;;  %s833_s18 = scalar_lea.vmem [#allocation3], %s830_s25 }
 0x488   : > { %v834_v26 = vld [vmem:[%s833_s18] sm:$0x1]  ;;  %s840_s22 = scalar_lea.vmem [#allocation2], %s838_s0  ;;  %s864_s28 = sadd.s32 5, %s1468_s19 }
 0x489   : > { %827 = vst [vmem:[#allocation4] sm:$0x1] %v826_v24  ;;  %v835_v27 = vadd.f32 %v834_v26, %v832_v25  ;;  %v841_v28 = vld [vmem:[%s840_s22] sm:$0x1]  ;;  %s842_s23 = scalar_lea.vmem [#allocation3], %s839_s27  ;;  %s873_s20 = sadd.s32 6, %s1468_s19 }
 0x48a   : > { %v843_v29 = vld [vmem:[%s842_s23] sm:$0x1]  ;;  %s849_s21 = scalar_lea.vmem [#allocation2], %s847_s30  ;;  %s865_s24 = sld [smem:[#allocation6 + %s864_s28]] }
 0x48b   : > { %v844_v30 = vadd.f32 %v843_v29, %v841_v28  ;;  %836 = vst [vmem:[#allocation4 + $0x1] sm:$0x1] %v835_v27  ;;  %v850_v31 = vld [vmem:[%s849_s21] sm:$0x1]  ;;  %s851_s29 = scalar_lea.vmem [#allocation3], %s848_s13  ;;  %s866_s26 = sld [smem:[#allocation7 + %s864_s28]] }
 0x48c   : > { %v852_v32 = vld [vmem:[%s851_s29] sm:$0x1]  ;;  %s858_s25 = scalar_lea.vmem [#allocation2], %s856_s15  ;;  %s874_s27 = sld [smem:[#allocation6 + %s873_s20]] }
 0x48d   : > { %845 = vst [vmem:[#allocation4 + $0x2] sm:$0x1] %v844_v30  ;;  %v853_v33 = vadd.f32 %v852_v32, %v850_v31  ;;  %v859_v34 = vld [vmem:[%s858_s25] sm:$0x1]  ;;  %s860_s0 = scalar_lea.vmem [#allocation3], %s857_s16  ;;  %s875_s14 = sld [smem:[#allocation7 + %s873_s20]] }
 0x48e   : > { %v861_v35 = vld [vmem:[%s860_s0] sm:$0x1]  ;;  %s882_s30 = sadd.s32 7, %s1468_s19  ;;  %s891_s17 = sadd.s32 8, %s1468_s19 }
 0x48f   : > { %854 = vst [vmem:[#allocation4 + $0x3] sm:$0x1] %v853_v33  ;;  %v862_v36 = vadd.f32 %v861_v35, %v859_v34  ;;  %s883_s18 = sld [smem:[#allocation6 + %s882_s30]]  ;;  %s900_s15 = sadd.s32 9, %s1468_s19 }
 0x490   : > { %s884_s22 = sld [smem:[#allocation7 + %s882_s30]]  ;;  %s867_s28 = scalar_lea.vmem [#allocation2], %s865_s24 }
 0x491   : > { %863 = vst [vmem:[#allocation4 + $0x4] sm:$0x1] %v862_v36  ;;  %s892_s13 = sld [smem:[#allocation6 + %s891_s17]]  ;;  %v868_v37 = vld [vmem:[%s867_s28] sm:$0x1]  ;;  %s869_s21 = scalar_lea.vmem [#allocation3], %s866_s26 }
 0x492   : > { %s893_s23 = sld [smem:[#allocation7 + %s891_s17]]  ;;  %v870_v38 = vld [vmem:[%s869_s21] sm:$0x1]  ;;  %s909_s16 = sadd.s32 10, %s1468_s19 }
 0x493   : > { %v871_v39 = vadd.f32 %v870_v38, %v868_v37  ;;  %s876_s29 = scalar_lea.vmem [#allocation2], %s874_s27  ;;  %s878_s25 = scalar_lea.vmem [#allocation3], %s875_s14 }
 0x494   : > { %v877_v40 = vld [vmem:[%s876_s29] sm:$0x1]  ;;  %s901_s20 = sld [smem:[#allocation6 + %s900_s15]]  ;;  %s918_s28 = sadd.s32 11, %s1468_s19 }
 0x495   : > { %v879_v41 = vld [vmem:[%s878_s25] sm:$0x1]  ;;  %s902_s0 = sld [smem:[#allocation7 + %s900_s15]]  ;;  %872 = vst [vmem:[#allocation4 + $0x5] sm:$0x1] %v871_v39  ;;  %s885_s30 = scalar_lea.vmem [#allocation2], %s883_s18 }
 0x496   : > { %v880_v42 = vadd.f32 %v879_v41, %v877_v40  ;;  %v886_v43 = vld [vmem:[%s885_s30] sm:$0x1]  ;;  %s887_s17 = scalar_lea.vmem [#allocation3], %s884_s22  ;;  %s910_s27 = sld [smem:[#allocation6 + %s909_s16]] }
 0x497   : > { %v888_v44 = vld [vmem:[%s887_s17] sm:$0x1]  ;;  %s894_s24 = scalar_lea.vmem [#allocation2], %s892_s13  ;;  %s911_s14 = sld [smem:[#allocation7 + %s909_s16]] }
 0x498   : > { %881 = vst [vmem:[#allocation4 + $0x6] sm:$0x1] %v880_v42  ;;  %v889_v46 = vadd.f32 %v888_v44, %v886_v43  ;;  %v895_v47 = vld [vmem:[%s894_s24] sm:$0x1]  ;;  %s896_s26 = scalar_lea.vmem [#allocation3], %s893_s23  ;;  %s927_s21 = sadd.s32 12, %s1468_s19 }
 0x499   : > { %v897_v48 = vld [vmem:[%s896_s26] sm:$0x1]  ;;  %s919_s15 = sld [smem:[#allocation6 + %s918_s28]]  ;;  %s936_s25 = sadd.s32 13, %s1468_s19 }
 0x49a   : > { %v898_v49 = vadd.f32 %v897_v48, %v895_v47  ;;  %890 = vst [vmem:[#allocation4 + $0x7] sm:$0x1] %v889_v46  ;;  %s920_s18 = sld [smem:[#allocation7 + %s918_s28]]  ;;  %s903_s22 = scalar_lea.vmem [#allocation2], %s901_s20 }
 0x49b   : > { %v904_v51 = vld [vmem:[%s903_s22] sm:$0x1]  ;;  %s905_s29 = scalar_lea.vmem [#allocation3], %s902_s0  ;;  %s928_s13 = sld [smem:[#allocation6 + %s927_s21]] }
 0x49c   : > { %899 = vst [vmem:[#allocation4 + $0x8] sm:$0x1] %v898_v49  ;;  %v906_v52 = vld [vmem:[%s905_s29] sm:$0x1]  ;;  %s929_s23 = sld [smem:[#allocation7 + %s927_s21]]  ;;  %s945_s16 = sadd.s32 14, %s1468_s19 }
 0x49d   : > { %v907_v53 = vadd.f32 %v906_v52, %v904_v51  ;;  %s912_s24 = scalar_lea.vmem [#allocation2], %s910_s27  ;;  %s914_s26 = scalar_lea.vmem [#allocation3], %s911_s14 }
 0x49e   : > { %v913_v55 = vld [vmem:[%s912_s24] sm:$0x1]  ;;  %s937_s28 = sld [smem:[#allocation6 + %s936_s25]]  ;;  %s954_s29 = sadd.s32 15, %s1468_s19 }
 0x49f   : > { %908 = vst [vmem:[#allocation4 + $0x9] sm:$0x1] %v907_v53  ;;  %v915_v56 = vld [vmem:[%s914_s26] sm:$0x1]  ;;  %s938_s2 = sld [smem:[#allocation7 + %s936_s25]]  ;;  %s921_s20 = scalar_lea.vmem [#allocation2], %s919_s15 }
 0x4a0   : > { %v916_v57 = vadd.f32 %v915_v56, %v913_v55  ;;  %v922_v59 = vld [vmem:[%s921_s20] sm:$0x1]  ;;  %s923_s0 = scalar_lea.vmem [#allocation3], %s920_s18  ;;  %s946_s21 = sld [smem:[#allocation6 + %s945_s16]] }
 0x4a1   : > { %v963_v58 = vld [vmem:[#allocation4] sm:$0xff]  ;;  %s930_s22 = scalar_lea.vmem [#allocation2], %s928_s13  ;;  %s947_s14 = sld [smem:[#allocation7 + %s945_s16]] }
 0x4a2   : > { %v924_v60 = vld [vmem:[%s923_s0] sm:$0x1]  ;;  %v972_v61 = vadd.f32 %v1127_v54, %v963_v58  ;;  %917 = vst [vmem:[#allocation4 + $0xa] sm:$0x1] %v916_v57  ;;  %s932_s27 = scalar_lea.vmem [#allocation3], %s929_s23  ;;  %s955_s25 = sld [smem:[#allocation6 + %s954_s29]] }
 0x4a3   : > { %v925_v62 = vadd.f32 %v924_v60, %v922_v59  ;;  %v931_v63 = vld [vmem:[%s930_s22] sm:$0x1]  ;;  %s956_s15 = sld [smem:[#allocation7 + %s954_s29]] }
 0x4a4   : > { %v933_v0 = vld [vmem:[%s932_s27] sm:$0x1]  ;;  %v977_v1 = vsel %vm976_vm4, %v972_v61, -1e+30  ;;  %s939_s18 = scalar_lea.vmem [#allocation2], %s937_s28 }
 0x4a5   : > { %926 = vst [vmem:[#allocation4 + $0xb] sm:$0x1] %v925_v62  ;;  %v934_v2 = vadd.f32 %v933_v0, %v931_v63  ;;  %979 = vmax.xlane.f32.xlu0 %v977_v1  ;;  %v940_v3 = vld [vmem:[%s939_s18] sm:$0x1]  ;;  %s941_s30 = scalar_lea.vmem [#allocation3], %s938_s2 }
 0x4a6   : > { %v942_v4 = vld [vmem:[%s941_s30] sm:$0x1]  ;;  %s948_s13 = scalar_lea.vmem [#allocation2], %s946_s21 }
 0x4a7   : > { %935 = vst [vmem:[#allocation4 + $0xc] sm:$0x1] %v934_v2  ;;  %v943_v5 = vadd.f32 %v942_v4, %v940_v3  ;;  %v949_v6 = vld [vmem:[%s948_s13] sm:$0x1]  ;;  %s950_s23 = scalar_lea.vmem [#allocation3], %s947_s14 }
 0x4a8   : > { %v951_v7 = vld [vmem:[%s950_s23] sm:$0x1]  ;;  %s957_s19 = scalar_lea.vmem [#allocation2], %s955_s25 }
 0x4a9   : > { %944 = vst [vmem:[#allocation4 + $0xd] sm:$0x1] %v943_v5  ;;  %v952_v8 = vadd.f32 %v951_v7, %v949_v6  ;;  %v958_v9 = vld [vmem:[%s957_s19] sm:$0x1]  ;;  %s959_s16 = scalar_lea.vmem [#allocation3], %s956_s15 }
 0x4aa   : > { %v960_v10 = vld [vmem:[%s959_s16] sm:$0x1] }
 0x4ab   : > { %v961_v11 = vadd.f32 %v960_v10, %v958_v9  ;;  %953 = vst [vmem:[#allocation4 + $0xe] sm:$0x1] %v952_v8 }
 0x4ad   : > { %962 = vst [vmem:[#allocation4 + $0xf] sm:$0x1] %v961_v11 }
 0x4b4   : > { %v964_v12 = vld [vmem:[#allocation4 + $0x8] sm:$0xff] }
 0x4b5   : > { %v973_v13 = vadd.f32 %v1127_v54, %v964_v12 }
 0x4b7   : > { %v978_v14 = vsel %vm976_vm4, %v973_v13, -1e+30 }
 0x4b8   : > { %981 = vmax.xlane.f32.xlu0 %v978_v14 }
 0x532   : > { %v980_v15 = vpop.xlane.xlu0 %979 }
 0x533   : > { %v983_v16 = vsub.f32 %v977_v1, %v980_v15 }
 0x535   : > { %v985_v17 = vmul.f32 1.442695, %v983_v16 }
 0x537   : > { %1212 = vpow2.f32 %v985_v17 }
 0x541   : > { %v1213_v18 = vpop.eup %1212 }
 0x542   : > { %989 = vadd.xlane.f32.xlu1 %v1213_v18 }
 0x545   : > { %v982_v19 = vpop.xlane.xlu0 %981 }
 0x546   : > { %v984_v20 = vsub.f32 %v978_v14, %v982_v19 }
 0x548   : > { %v987_v21 = vmul.f32 1.442695, %v984_v20 }
 0x54a   : > { %1214 = vpow2.f32 %v987_v21 }
 0x554   : > { %v1215_v22 = vpop.eup %1214 }
 0x555   : > { %991 = vadd.xlane.f32.xlu1 %v1215_v22 }
 0x5cf   : > { %v990_v23 = vpop.xlane.xlu1 %989 }
 0x5d0   : > { %1216 = vlog2.f32 %v990_v23 }
 0x5da   : > { %v1217_v24 = vpop.eup %1216 }
 0x5db   : > { %v994_v25 = vmul.f32 0.6931472, %v1217_v24 }
 0x5dd   : > { %v997_v26 = vsub.f32 %v983_v16, %v994_v25 }
 0x5df   : > { %999 = vst [vmem:[%s1339_s12] sm:$0xff] %v997_v26 }
 0x5e2   : > { %v992_v27 = vpop.xlane.xlu1 %991 }
 0x5e3   : > { %1218 = vlog2.f32 %v992_v27 }
 0x5ed   : > { %v1219_v28 = vpop.eup %1218 }
 0x5ee   : > { %v996_v29 = vmul.f32 0.6931472, %v1219_v28 }
 0x5f0   : > { %v998_v30 = vsub.f32 %v984_v20, %v996_v29 }
 0x5f2   : > { %1000 = vst [vmem:[%s1339_s12 + $0x8] sm:$0xff] %v998_v30 }
 0x5f3 PF: > { %s31_s1 = sadd.s32 1, %s1252_s1  }
 0x5f4   : > { %p28_p1 = scmp.ge.s32.totalorder %s31_s1, 4  }
 0x5f6   :  { %30 = sbr.rel (!%p28_p1) target bundleno = 27 (0x1b), region = 119 }

</bundles_post_ra>
